<compile_context>
chip_gen: v5e
topology: v5e:2x2
jax: 0.10.0
libtpu: 0.0.40
codegen_flags: <defaults>
</compile_context>

<pallas_src>
import functools

import jax
import jax.numpy as jnp
from jax import lax
from jax.experimental import pallas as pl
from jax.experimental.pallas import tpu as pltpu


def _ltpc_kernel(img_h, x_ref, w1p_ref, aff_ref, w2_ref, out_ref):
    M, WCi = x_ref.shape           # M = NB * H rows (NB whole images)
    WCo = out_ref.shape[-1]

    # Per-image H-boundary masks (rows are whole images stacked along M).
    row = lax.broadcasted_iota(jnp.int32, (M, 1), 0)
    first = (row % img_h) == 0
    last = (row % img_h) == (img_h - 1)

    def band_lhs(v):
        """[v shifted down | v | v shifted up] along lanes, SAME-padded per image."""
        z = jnp.zeros((1, v.shape[-1]), v.dtype)
        up = jnp.concatenate([z, v[:M - 1, :]], axis=0)        # row h-1
        up = jnp.where(first, jnp.zeros((), v.dtype), up)
        dn = jnp.concatenate([v[1:, :], z], axis=0)             # row h+1
        dn = jnp.where(last, jnp.zeros((), v.dtype), dn)
        return jnp.concatenate([up, v, dn], axis=1)             # (M, 3*width)

    # ---- conv1 + fused 1x1 shortcut: one band matmul over the whole block ----
    L1 = band_lhs(x_ref[...])                                   # (M, 3*W*Cin) bf16
    acc1 = jnp.dot(L1, w1p_ref[...], preferred_element_type=jnp.float32)
    pre1 = acc1[:, :WCo]                                        # conv1 pre-activation
    res = acc1[:, WCo:]                                         # 1x1 shortcut (bias folded)

    # BN1 (eval affine; conv bias folded into shift) + ReLU, lane-dense f32.
    s1 = aff_ref[0:1, :]
    t1 = aff_ref[1:2, :]
    h = jnp.maximum(pre1 * s1 + t1, 0.0)
    # TODO(synk): nn.Dropout is identity in eval mode; training-mode dropout /
    # batch-statistics BN are not implemented here.

    # ---- conv2: one band matmul on the intermediate ----
    L2 = band_lhs(h.astype(jnp.bfloat16))                       # (M, 3*W*Cout)
    acc2 = jnp.dot(L2, w2_ref[...], preferred_element_type=jnp.float32)

    # BN2 (conv bias + shortcut bias folded into shift) + residual add.
    s2 = aff_ref[2:3, :]
    t2 = aff_ref[3:4, :]
    out_ref[...] = acc2 * s2 + t2 + res


def _conv_band(wk, W):
    """Fold a (3,3,Ci,Co) HWIO kernel into a (3*W*Ci, W*Co) band matrix.

    Row index = ky*W*Ci + w'*Ci + ci, column index = w*Co + co; SAME
    zero-padding along W is baked in by dropping out-of-range taps.
    """
    _, _, Ci, Co = wk.shape
    p = jnp.arange(W)[:, None, None]            # input column w'
    k = jnp.arange(3)[None, :, None]            # kx tap
    w = jnp.arange(W)[None, None, :]            # output column w
    sel = (p == w + k - 1).astype(wk.dtype)     # (W, 3, W)
    band = jnp.einsum("pkw,ykio->ypiwo", sel, wk)
    return band.reshape(3 * W * Ci, W * Co)


def _shortcut_band(w11, W):
    """Fold a 1x1 conv (Ci, Co) into the center-ky slab of a band matrix."""
    Ci, Co = w11.shape
    eye = jnp.eye(W, dtype=w11.dtype)
    center = jnp.einsum("pw,io->piwo", eye, w11).reshape(W * Ci, W * Co)
    zeros = jnp.zeros((W * Ci, W * Co), w11.dtype)
    return jnp.concatenate([zeros, center, zeros], axis=0)


def long_term_period_conv(x_nchw, params):
    """x_nchw: [N, Cin, H, W].  Returns [N, Cout, H, W] (eval mode)."""
    N, Cin, H, W = x_nchw.shape
    Cout = params["w1"].shape[-1]
    eps = 1e-5
    WCi, WCo = W * Cin, W * Cout

    # NCHW -> (N*H, W*Cin) channels-last rows; bf16 for the MXU / HBM DMA.
    x_rows = jnp.transpose(x_nchw, (0, 2, 3, 1)).reshape(N * H, WCi)
    x_rows = x_rows.astype(jnp.bfloat16)

    # Batch block size: target ~512 matmul rows per grid step.
    nb = max(1, min(N, 512 // max(H, 1)))
    if (nb * H) % 8 != 0:
        nb = N                       # full-extent block is always layout-legal
    n_pad = pl.cdiv(N, nb) * nb
    if n_pad != N:
        pad = jnp.zeros(((n_pad - N) * H, WCi), jnp.bfloat16)
        x_rows = jnp.concatenate([x_rows, pad], axis=0)

    # BN affine folded with conv biases (b11 folded into the final shift).
    s1 = params["bn1_gamma"] / jnp.sqrt(params["bn1_var"] + eps)
    t1 = params["bn1_beta"] - params["bn1_mean"] * s1 + s1 * params["b1"]
    s2 = params["bn2_gamma"] / jnp.sqrt(params["bn2_var"] + eps)
    t2 = (params["bn2_beta"] - params["bn2_mean"] * s2 + s2 * params["b2"]
          + params["b11"])

    def lanes(v):  # per-channel vector -> per-lane (W*Cout,) f32 row
        return jnp.tile(v.astype(jnp.float32), W)

    affine = jnp.stack([lanes(s1), lanes(t1), lanes(s2), lanes(t2)], axis=0)

    # Banded weights: conv1 with fused 1x1 shortcut -> (3*W*Cin, 2*W*Cout).
    w1_band = _conv_band(params["w1"].astype(jnp.float32), W)
    sc_band = _shortcut_band(params["w11"].astype(jnp.float32), W)
    w1_packed = jnp.concatenate([w1_band, sc_band], axis=1).astype(jnp.bfloat16)
    w2_band = _conv_band(params["w2"].astype(jnp.float32), W).astype(jnp.bfloat16)

    out2d = pl.pallas_call(
        functools.partial(_ltpc_kernel, H),
        out_shape=jax.ShapeDtypeStruct((n_pad * H, WCo), jnp.float32),
        grid=(n_pad // nb,),
        in_specs=[
            pl.BlockSpec((nb * H, WCi), lambda i: (i, 0)),
            pl.BlockSpec((3 * WCi, 2 * WCo), lambda i: (0, 0)),
            pl.BlockSpec((4, WCo), lambda i: (0, 0)),
            pl.BlockSpec((3 * WCo, WCo), lambda i: (0, 0)),
        ],
        out_specs=pl.BlockSpec((nb * H, WCo), lambda i: (i, 0)),
        compiler_params=pltpu.CompilerParams(
            dimension_semantics=("parallel",)),
    )(x_rows, w1_packed, affine, w2_band)

    out = out2d[:N * H].reshape(N, H, W, Cout)
    return jnp.transpose(out, (0, 3, 1, 2))  # back to NCHW


def _ref_forward(x_nchw, params):
    """Pure-JAX reference (lax.conv), eval mode; bf16 matmul, f32 accum."""
    bf, f32 = jnp.bfloat16, jnp.float32
    x = jnp.transpose(x_nchw, (0, 2, 3, 1)).astype(f32)
    eps = 1e-5

    def bn(h, g, b, m, v):
        return (h - m) / jnp.sqrt(v + eps) * g + b

    dn = lax.conv_dimension_numbers(x.shape, params["w1"].shape,
                                    ("NHWC", "HWIO", "NHWC"))
    h = lax.conv_general_dilated(x.astype(bf), params["w1"].astype(bf),
                                 (1, 1), "SAME", dimension_numbers=dn,
                                 preferred_element_type=f32) + params["b1"]
    h = bn(h, params["bn1_gamma"], params["bn1_beta"],
           params["bn1_mean"], params["bn1_var"])
    h = jnp.maximum(h, 0.0)
    dn2 = lax.conv_dimension_numbers(h.shape, params["w2"].shape,
                                     ("NHWC", "HWIO", "NHWC"))
    h2 = lax.conv_general_dilated(h.astype(bf), params["w2"].astype(bf),
                                  (1, 1), "SAME", dimension_numbers=dn2,
                                  preferred_element_type=f32) + params["b2"]
    h2 = bn(h2, params["bn2_gamma"], params["bn2_beta"],
            params["bn2_mean"], params["bn2_var"])
    res = jnp.einsum("nhwc,co->nhwo", x.astype(bf), params["w11"].astype(bf),
                     preferred_element_type=f32) + params["b11"]
    return jnp.transpose(h2 + res, (0, 3, 1, 2))


def _init_params(key, cin, cout):
    ks = jax.random.split(key, 10)
    f32 = jnp.float32
    return {
        "w1": 0.1 * jax.random.normal(ks[0], (3, 3, cin, cout), f32),
        "b1": 0.1 * jax.random.normal(ks[1], (cout,), f32),
        "bn1_gamma": 1.0 + 0.1 * jax.random.normal(ks[2], (cout,), f32),
        "bn1_beta": 0.1 * jax.random.normal(ks[3], (cout,), f32),
        "bn1_mean": 0.05 * jax.random.normal(ks[4], (cout,), f32),
        "bn1_var": 1.0 + 0.1 * jnp.abs(jax.random.normal(ks[5], (cout,), f32)),
        "w2": 0.1 * jax.random.normal(ks[6], (3, 3, cout, cout), f32),
        "b2": 0.1 * jax.random.normal(ks[7], (cout,), f32),
        "bn2_gamma": 1.0 + 0.1 * jax.random.normal(ks[8], (cout,), f32),
        "bn2_beta": 0.1 * jax.random.normal(ks[9], (cout,), f32),
        "bn2_mean": 0.05 * jax.random.normal(ks[0], (cout,), f32),
        "bn2_var": 1.0 + 0.1 * jnp.abs(jax.random.normal(ks[1], (cout,), f32)),
        "w11": 0.1 * jax.random.normal(ks[2], (cin, cout), f32),
        "b11": 0.1 * jax.random.normal(ks[3], (cout,), f32),
    }


if __name__ == "__main__":
    key = jax.random.PRNGKey(0)
    kx, kp = jax.random.split(key)
    N, Cin, Cout, H, W = 2, 4, 8, 16, 16
    x = jax.random.normal(kx, (N, Cin, H, W), jnp.float32)
    params = _init_params(kp, Cin, Cout)

    out = jax.block_until_ready(long_term_period_conv(x, params))
    ref = jax.block_until_ready(_ref_forward(x, params))

    assert out.shape == (N, Cout, H, W)
    assert jnp.allclose(out, ref, rtol=5e-3, atol=5e-3), \
        f"max abs err {jnp.max(jnp.abs(out - ref))}"
    print("KERNEL_OK")
</pallas_src>

<mosaic_0001>
module attributes {stable_mosaic.version = 11 : i64} {
  func.func @_ltpc_kernel(%arg0: i32, %arg1: memref<32x64xbf16, #tpu.memory_space<vmem>>, %arg2: memref<192x256xbf16, #tpu.memory_space<vmem>>, %arg3: memref<4x128xf32, #tpu.memory_space<vmem>>, %arg4: memref<384x128xbf16, #tpu.memory_space<vmem>>, %arg5: memref<32x128xf32, #tpu.memory_space<vmem>>) attributes {dimension_semantics = [#tpu.dimension_semantics<parallel>], iteration_bounds = array<i64: 1>, scalar_prefetch = 0 : i64, scratch_operands = 0 : i64, tpu.core_type = #tpu.core_type<tc>, window_params = [{transform_indices = @transform_0, window_bounds = array<i64: 32, 64>}, {pipeline_mode = #tpu.pipeline_mode<synchronous>, transform_indices = @transform_1, window_bounds = array<i64: 192, 256>}, {pipeline_mode = #tpu.pipeline_mode<synchronous>, transform_indices = @transform_2, window_bounds = array<i64: 4, 128>}, {pipeline_mode = #tpu.pipeline_mode<synchronous>, transform_indices = @transform_3, window_bounds = array<i64: 384, 128>}, {transform_indices = @transform_4, window_bounds = array<i64: 32, 128>}]} {
    %0 = tpu.iota {dimensions = array<i32: 0>} : vector<32x1xi32>
    %c16_i32 = arith.constant 16 : i32
    %c0_i32 = arith.constant 0 : i32
    %1 = arith.cmpi eq, %c16_i32, %c0_i32 : i32
    %c1_i32 = arith.constant 1 : i32
    %2 = arith.select %1, %c1_i32, %c16_i32 : i32
    %3 = vector.broadcast %2 : i32 to vector<32x1xi32>
    %4 = arith.remsi %0, %3 : vector<32x1xi32>
    %c0_i32_0 = arith.constant 0 : i32
    %5 = vector.broadcast %c0_i32_0 : i32 to vector<32x1xi32>
    %6 = arith.cmpi ne, %4, %5 : vector<32x1xi32>
    %c0_i32_1 = arith.constant 0 : i32
    %7 = vector.broadcast %c0_i32_1 : i32 to vector<32x1xi32>
    %8 = arith.cmpi slt, %4, %7 : vector<32x1xi32>
    %c0_i32_2 = arith.constant 0 : i32
    %9 = arith.cmpi slt, %2, %c0_i32_2 : i32
    %10 = vector.broadcast %9 : i1 to vector<32x1xi1>
    %11 = vector.broadcast %10 : vector<32x1xi1> to vector<32x1xi1>
    %12 = arith.xori %8, %11 : vector<32x1xi1>
    %13 = arith.andi %12, %6 : vector<32x1xi1>
    %14 = vector.broadcast %2 : i32 to vector<32x1xi32>
    %15 = arith.addi %4, %14 : vector<32x1xi32>
    %16 = arith.select %13, %15, %4 : vector<32x1xi1>, vector<32x1xi32>
    %c0_i32_3 = arith.constant 0 : i32
    %17 = vector.broadcast %c0_i32_3 : i32 to vector<32x1xi32>
    %18 = arith.cmpi eq, %16, %17 : vector<32x1xi32>
    %c16_i32_4 = arith.constant 16 : i32
    %c0_i32_5 = arith.constant 0 : i32
    %19 = arith.cmpi eq, %c16_i32_4, %c0_i32_5 : i32
    %c1_i32_6 = arith.constant 1 : i32
    %20 = arith.select %19, %c1_i32_6, %c16_i32_4 : i32
    %21 = vector.broadcast %20 : i32 to vector<32x1xi32>
    %22 = arith.remsi %0, %21 : vector<32x1xi32>
    %c0_i32_7 = arith.constant 0 : i32
    %23 = vector.broadcast %c0_i32_7 : i32 to vector<32x1xi32>
    %24 = arith.cmpi ne, %22, %23 : vector<32x1xi32>
    %c0_i32_8 = arith.constant 0 : i32
    %25 = vector.broadcast %c0_i32_8 : i32 to vector<32x1xi32>
    %26 = arith.cmpi slt, %22, %25 : vector<32x1xi32>
    %c0_i32_9 = arith.constant 0 : i32
    %27 = arith.cmpi slt, %20, %c0_i32_9 : i32
    %28 = vector.broadcast %27 : i1 to vector<32x1xi1>
    %29 = vector.broadcast %28 : vector<32x1xi1> to vector<32x1xi1>
    %30 = arith.xori %26, %29 : vector<32x1xi1>
    %31 = arith.andi %30, %24 : vector<32x1xi1>
    %32 = vector.broadcast %20 : i32 to vector<32x1xi32>
    %33 = arith.addi %22, %32 : vector<32x1xi32>
    %34 = arith.select %31, %33, %22 : vector<32x1xi1>, vector<32x1xi32>
    %c15_i32 = arith.constant 15 : i32
    %35 = vector.broadcast %c15_i32 : i32 to vector<32x1xi32>
    %36 = arith.cmpi eq, %34, %35 : vector<32x1xi32>
    %c0 = arith.constant 0 : index
    %c0_10 = arith.constant 0 : index
    %37 = vector.load %arg1[%c0, %c0_10] : memref<32x64xbf16, #tpu.memory_space<vmem>>, vector<32x64xbf16>
    %cst = arith.constant 0.000000e+00 : bf16
    %38 = vector.broadcast %cst : bf16 to vector<1x64xbf16>
    %39 = vector.extract_strided_slice %37 {offsets = [0, 0], sizes = [31, 64], strides = [1, 1]} : vector<32x64xbf16> to vector<31x64xbf16>
    %40 = tpu.concatenate %38, %39 in 0 : vector<1x64xbf16>, vector<31x64xbf16> -> vector<32x64xbf16>
    %cst_11 = arith.constant 0.000000e+00 : bf16
    %41 = vector.shape_cast %18 : vector<32x1xi1> to vector<32x1xi1>
    %42 = vector.broadcast %41 : vector<32x1xi1> to vector<32x64xi1>
    %43 = vector.broadcast %cst_11 : bf16 to vector<32x64xbf16>
    %44 = arith.select %42, %43, %40 : vector<32x64xi1>, vector<32x64xbf16>
    %45 = vector.extract_strided_slice %37 {offsets = [1, 0], sizes = [31, 64], strides = [1, 1]} : vector<32x64xbf16> to vector<31x64xbf16>
    %46 = tpu.concatenate %45, %38 in 0 : vector<31x64xbf16>, vector<1x64xbf16> -> vector<32x64xbf16>
    %cst_12 = arith.constant 0.000000e+00 : bf16
    %47 = vector.shape_cast %36 : vector<32x1xi1> to vector<32x1xi1>
    %48 = vector.broadcast %47 : vector<32x1xi1> to vector<32x64xi1>
    %49 = vector.broadcast %cst_12 : bf16 to vector<32x64xbf16>
    %50 = arith.select %48, %49, %46 : vector<32x64xi1>, vector<32x64xbf16>
    %51 = tpu.concatenate %44, %37, %50 in 1 : vector<32x64xbf16>, vector<32x64xbf16>, vector<32x64xbf16> -> vector<32x192xbf16>
    %c0_13 = arith.constant 0 : index
    %c0_14 = arith.constant 0 : index
    %52 = vector.load %arg2[%c0_13, %c0_14] : memref<192x256xbf16, #tpu.memory_space<vmem>>, vector<192x256xbf16>
    %cst_15 = arith.constant dense<0.000000e+00> : vector<32x256xf32>
    %53 = tpu.matmul %51, %52, %cst_15 {dimension_numbers = #tpu.dot_dimension_numbers<[1], [0], [0], [1], [0, 0, 1, 1], [], []>} : vector<32x192xbf16>, vector<192x256xbf16>, vector<32x256xf32> -> vector<32x256xf32>
    %54 = vector.extract_strided_slice %53 {offsets = [0, 0], sizes = [32, 128], strides = [1, 1]} : vector<32x256xf32> to vector<32x128xf32>
    %55 = vector.extract_strided_slice %53 {offsets = [0, 128], sizes = [32, 128], strides = [1, 1]} : vector<32x256xf32> to vector<32x128xf32>
    %c0_16 = arith.constant 0 : index
    %c0_17 = arith.constant 0 : index
    %56 = vector.load %arg3[%c0_16, %c0_17] : memref<4x128xf32, #tpu.memory_space<vmem>>, vector<1x128xf32>
    %c1 = arith.constant 1 : index
    %c0_18 = arith.constant 0 : index
    %57 = vector.load %arg3[%c1, %c0_18] : memref<4x128xf32, #tpu.memory_space<vmem>>, vector<1x128xf32>
    %58 = vector.broadcast %56 : vector<1x128xf32> to vector<32x128xf32>
    %59 = arith.mulf %54, %58 : vector<32x128xf32>
    %60 = vector.broadcast %57 : vector<1x128xf32> to vector<32x128xf32>
    %61 = arith.addf %59, %60 : vector<32x128xf32>
    %cst_19 = arith.constant 0.000000e+00 : f32
    %62 = vector.broadcast %cst_19 : f32 to vector<32x128xf32>
    %63 = arith.maximumf %61, %62 : vector<32x128xf32>
    %64 = arith.truncf %63 : vector<32x128xf32> to vector<32x128xbf16>
    %cst_20 = arith.constant 0.000000e+00 : bf16
    %65 = vector.broadcast %cst_20 : bf16 to vector<1x128xbf16>
    %66 = vector.extract_strided_slice %64 {offsets = [0, 0], sizes = [31, 128], strides = [1, 1]} : vector<32x128xbf16> to vector<31x128xbf16>
    %67 = tpu.concatenate %65, %66 in 0 : vector<1x128xbf16>, vector<31x128xbf16> -> vector<32x128xbf16>
    %cst_21 = arith.constant 0.000000e+00 : bf16
    %68 = vector.shape_cast %18 : vector<32x1xi1> to vector<32x1xi1>
    %69 = vector.broadcast %68 : vector<32x1xi1> to vector<32x128xi1>
    %70 = vector.broadcast %cst_21 : bf16 to vector<32x128xbf16>
    %71 = arith.select %69, %70, %67 : vector<32x128xi1>, vector<32x128xbf16>
    %72 = vector.extract_strided_slice %64 {offsets = [1, 0], sizes = [31, 128], strides = [1, 1]} : vector<32x128xbf16> to vector<31x128xbf16>
    %73 = tpu.concatenate %72, %65 in 0 : vector<31x128xbf16>, vector<1x128xbf16> -> vector<32x128xbf16>
    %cst_22 = arith.constant 0.000000e+00 : bf16
    %74 = vector.shape_cast %36 : vector<32x1xi1> to vector<32x1xi1>
    %75 = vector.broadcast %74 : vector<32x1xi1> to vector<32x128xi1>
    %76 = vector.broadcast %cst_22 : bf16 to vector<32x128xbf16>
    %77 = arith.select %75, %76, %73 : vector<32x128xi1>, vector<32x128xbf16>
    %78 = tpu.concatenate %71, %64, %77 in 1 : vector<32x128xbf16>, vector<32x128xbf16>, vector<32x128xbf16> -> vector<32x384xbf16>
    %c0_23 = arith.constant 0 : index
    %c0_24 = arith.constant 0 : index
    %79 = vector.load %arg4[%c0_23, %c0_24] : memref<384x128xbf16, #tpu.memory_space<vmem>>, vector<384x128xbf16>
    %cst_25 = arith.constant dense<0.000000e+00> : vector<32x128xf32>
    %80 = tpu.matmul %78, %79, %cst_25 {dimension_numbers = #tpu.dot_dimension_numbers<[1], [0], [0], [1], [0, 0, 1, 1], [], []>} : vector<32x384xbf16>, vector<384x128xbf16>, vector<32x128xf32> -> vector<32x128xf32>
    %c2 = arith.constant 2 : index
    %c0_26 = arith.constant 0 : index
    %81 = vector.load %arg3[%c2, %c0_26] : memref<4x128xf32, #tpu.memory_space<vmem>>, vector<1x128xf32>
    %c3 = arith.constant 3 : index
    %c0_27 = arith.constant 0 : index
    %82 = vector.load %arg3[%c3, %c0_27] : memref<4x128xf32, #tpu.memory_space<vmem>>, vector<1x128xf32>
    %83 = vector.broadcast %81 : vector<1x128xf32> to vector<32x128xf32>
    %84 = arith.mulf %80, %83 : vector<32x128xf32>
    %85 = vector.broadcast %82 : vector<1x128xf32> to vector<32x128xf32>
    %86 = arith.addf %84, %85 : vector<32x128xf32>
    %87 = arith.addf %86, %55 : vector<32x128xf32>
    %c0_28 = arith.constant 0 : index
    %c0_29 = arith.constant 0 : index
    %88 = vector.load %arg5[%c0_28, %c0_29] : memref<32x128xf32, #tpu.memory_space<vmem>>, vector<32x128xf32>
    tpu.vector_store %arg5[%c0_28, %c0_29], %87 {strides = array<i32>} : memref<32x128xf32, #tpu.memory_space<vmem>>, vector<32x128xf32>,
    return
  }
  func.func @transform_0(%arg0: i32) -> (i32, i32) {
    %c0_i32 = arith.constant 0 : i32
    %c0_i32_0 = arith.constant 0 : i32
    return %arg0, %c0_i32 : i32, i32
  }
  func.func @transform_1(%arg0: i32) -> (i32, i32) {
    %c0_i32 = arith.constant 0 : i32
    %c0_i32_0 = arith.constant 0 : i32
    %c0_i32_1 = arith.constant 0 : i32
    return %c0_i32, %c0_i32_0 : i32, i32
  }
  func.func @transform_2(%arg0: i32) -> (i32, i32) {
    %c0_i32 = arith.constant 0 : i32
    %c0_i32_0 = arith.constant 0 : i32
    %c0_i32_1 = arith.constant 0 : i32
    return %c0_i32, %c0_i32_0 : i32, i32
  }
  func.func @transform_3(%arg0: i32) -> (i32, i32) {
    %c0_i32 = arith.constant 0 : i32
    %c0_i32_0 = arith.constant 0 : i32
    %c0_i32_1 = arith.constant 0 : i32
    return %c0_i32, %c0_i32_0 : i32, i32
  }
  func.func @transform_4(%arg0: i32) -> (i32, i32) {
    %c0_i32 = arith.constant 0 : i32
    %c0_i32_0 = arith.constant 0 : i32
    return %arg0, %c0_i32 : i32, i32
  }
}

</mosaic_0001>

<bundles_post_ra>
// kernel: tpu_custom_call.1
= control target key start
LH: loop header
LB: loop body
LE: loop exit
PB: predicated region body
PF: predicated region fallthrough
CT: control target
= control target key end

     0   :  { %9 = vsyncpa [#allocation3], 0  ;;  %s1457_s0 = inlined_call_operand.hbm [shape: bf16[32,64], index: 0, kind: input, shape index: {}]   ;;  %s1458_s1 = inlined_call_operand.hbm [shape: bf16[192,256], index: 1, kind: input, shape index: {}]   ;;  %s1459_s2 = inlined_call_operand.hbm [shape: f32[4,128], index: 2, kind: input, shape index: {}]   ;;  %s1460_s3 = inlined_call_operand.hbm [shape: bf16[384,128], index: 3, kind: input, shape index: {}]   ;;  %s1461_s4 = inlined_call_operand.hbm [shape: f32[32,128], index: 4, kind: output, shape index: {}]  }
   0x1   :  { %10 = vsyncpa [#allocation6], 0 }
   0x2   :  { %11 = vsyncpa [#allocation9], 0  ;;  %s30_s17 = sshll.u32 %s1458_s1, 4  ;;  %s31_s17 = int_to_ptr.hbm [resolvable:$true] %s30_s17 }
   0x3   :  { %12 = vsyncpa [#allocation4], 0  ;;  %s1269_s18 = smov [#allocation5]   ;;  %s17_s22 = sshll.u32 %s1457_s0, 4  ;;  %s18_s22 = int_to_ptr.hbm [resolvable:$true] %s17_s22 }
   0x4   :  { %s32_s19 = sshll.u32 %s1269_s18, 4  ;;  %s1270_s23 = smov 128   ;;  %s33_s19 = int_to_ptr.vmem [resolvable:$true] %s32_s19 }
   0x5   :  { %s1271_s24 = smov 8   ;;  %s1272_s25 = smov [#allocation2]  }
   0x6   :  { %38 = dma.hbm_to_vmem [thread:$0]  %s31_s17, 3072, %s33_s19, [#allocation6], %s1270_s23, %s1270_s23, %s1271_s24  }
   0x7   :  { %s19_s26 = sshll.u32 %s1272_s25, 4  ;;  %s1273_s1 = smov 64   ;;  %s20_s26 = int_to_ptr.vmem [resolvable:$true] %s19_s26 }
   0x8   :  { %s1274_s27 = smov 4   ;;  %s44_s30 = sshll.u32 %s1459_s2, 4  ;;  %s45_s30 = int_to_ptr.hbm [resolvable:$true] %s44_s30 }
   0x9   :  { %25 = dma.hbm_to_vmem [thread:$0]  %s18_s22, 256, %s20_s26, [#allocation3], %s1273_s1, %s1273_s1, %s1274_s27  }
   0xa   :  { %s1275_s0 = smov [#allocation7]   ;;  %s54_s8 = sshll.u32 %s1460_s3, 4  ;;  %s55_s8 = int_to_ptr.hbm [resolvable:$true] %s54_s8 }
   0xb   :  { %s46_s5 = sshll.u32 %s1275_s0, 4  ;;  %s1276_s9 = smov [#allocation8]   ;;  %s47_s5 = int_to_ptr.vmem [resolvable:$true] %s46_s5 }
   0xc   :  { %49 = dma.hbm_to_vmem [thread:$0]  %s45_s30, 64, %s47_s5, [#allocation6]  }
   0xd   :  { %s56_s10 = sshll.u32 %s1276_s9, 4  ;;  %s57_s10 = int_to_ptr.vmem [resolvable:$true] %s56_s10 }
   0xe   :  { %62 = dma.hbm_to_vmem [thread:$0]  %s55_s8, 3072, %s57_s10, [#allocation9], %s1273_s1, %s1273_s1, %s1274_s27  }
   0xf   :  { %1261 = dma.done.wait [#allocation3], 256  }
  0x10   :  { %1262 = vsyncadd [#allocation3], 4294967040 }
  0x11   :  { %1263 = dma.done.wait [#allocation6], 3136  }
  0x12   :  { %1264 = vsyncadd [#allocation6], 4294964160 }
  0x13   :  { %1265 = dma.done.wait [#allocation9], 3072  }
  0x14   :  { %1266 = vsyncadd [#allocation9], 4294964224  ;;  %v82_v0 = vlaneseq  ;;  %v1324_v1 = vld [vmem:[#allocation2] sm:$0xff]  ;;  %v1085_v4 = vld [vmem:[#allocation5 + $0x74] sm:$0xf0]  ;;  %vm1277_vm0 = vmmov 0  }
  0x15   :  { %v930_v2 = vld [vmem:[#allocation5 + $0x70] sm:$0xf]  ;;  %v1084_v5 = vld [vmem:[#allocation5 + $0x74] sm:$0xf]  ;;  %v932_v6 = vld [vmem:[#allocation5 + $0x78] sm:$0xf0]  ;;  %265 = vrot.lane.b32.xlu0 %v1324_v1, %s1273_s1 }
  0x16   :  { %v1326_v3 = vshrl.u32 %v82_v0, 7  ;;  %v931_v7 = vor.u32 %v1085_v4, %v930_v2  ;;  %v922_v8 = vld [vmem:[#allocation5 + $0x60] sm:$0xf]  ;;  %v935_v9 = vor.u32 %v1084_v5, %v932_v6  ;;  %v1083_v10 = vld [vmem:[#allocation5 + $0x64] sm:$0xf0]  ;;  %v1330_v13 = vld [vmem:[#allocation2 + $0x8] sm:$0xff] }
  0x17   :  { %v1082_v11 = vld [vmem:[#allocation5 + $0x64] sm:$0xf]  ;;  %v924_v12 = vld [vmem:[#allocation5 + $0x68] sm:$0xf0]  ;;  %v923_v14 = vor.u32 %v1083_v10, %v922_v8  ;;  %v962_v15 = vld [vmem:[#allocation5 + $0xb0] sm:$0xf] }
  0x18   :  { %428 = vmatpush.bf16.msra.mxu0 %v931_v7  ;;  %v84_v16 = vadd.s32 8, %v1326_v3  ;;  %vm187_vm1 = vmpackc.low %vm1277_vm0, %vm1277_vm0  ;;  %466 = vmatpush.bf16.msra.mxu2 %v935_v9  ;;  %v927_v17 = vor.u32 %v1082_v11, %v924_v12  ;;  %v914_v18 = vld [vmem:[#allocation5 + $0x50] sm:$0xf]  ;;  %v1081_v19 = vld [vmem:[#allocation5 + $0x54] sm:$0xf0]  ;;  %v1278_v26 = vmov 0  }
  0x19   :  { %v1093_v20 = vld [vmem:[#allocation5 + $0xb4] sm:$0xf0]  ;;  %v1080_v22 = vld [vmem:[#allocation5 + $0x54] sm:$0xf]  ;;  %v916_v23 = vld [vmem:[#allocation5 + $0x58] sm:$0xf0]  ;;  %v915_v29 = vor.u32 %v1081_v19, %v914_v18  ;;  %v1344_v59 = vunpack.c.l.b16 %v1278_v26  ;;  %v1354_v4 = vunpack.c.h.b16 %v1278_v26 }
  0x1a   :  { %v963_v21 = vor.u32 %v1093_v20, %v962_v15  ;;  %v954_v24 = vld [vmem:[#allocation5 + $0xa0] sm:$0xf]  ;;  %v1091_v25 = vld [vmem:[#allocation5 + $0xa4] sm:$0xf0]  ;;  %v191_v27 = vsel %vm187_vm1, 65537, %v1278_v26  ;;  %v162_v28 = vshll.u32 %v1324_v1, 16  ;;  %v919_v34 = vor.u32 %v1080_v22, %v916_v23 }
  0x1b   :  { %v906_v30 = vld [vmem:[#allocation5 + $0x40] sm:$0xf]  ;;  %v1079_v31 = vld [vmem:[#allocation5 + $0x44] sm:$0xf0]  ;;  %v955_v32 = vor.u32 %v1091_v25, %v954_v24  ;;  %v98_v33 = vand.u32 15, %v84_v16  ;;  %v195_v41 = vunpack.c.l.b16 %v191_v27  ;;  %v159_v42 = vshrl.u32 %v1324_v1, 16 }
  0x1c   :  { %429 = vmatpush.bf16.msra.mxu0 %v923_v14  ;;  %451 = vmatpush.bf16.msra.mxu1 %v963_v21  ;;  %v1078_v35 = vld [vmem:[#allocation5 + $0x44] sm:$0xf]  ;;  %v946_v36 = vld [vmem:[#allocation5 + $0x90] sm:$0xf]  ;;  %v1089_v37 = vld [vmem:[#allocation5 + $0x94] sm:$0xf0]  ;;  %v907_v46 = vor.u32 %v1079_v31, %v906_v30 }
  0x1d   :  { %467 = vmatpush.bf16.msra.mxu2 %v927_v17  ;;  %267 = vrot.lane.b32.xlu0 %v1330_v13, %s1273_s1  ;;  %v908_v38 = vld [vmem:[#allocation5 + $0x48] sm:$0xf0]  ;;  %v1092_v39 = vld [vmem:[#allocation5 + $0xb4] sm:$0xf]  ;;  %v964_v40 = vld [vmem:[#allocation5 + $0xb8] sm:$0xf0]  ;;  %v947_v48 = vor.u32 %v1089_v37, %v946_v36  ;;  %v1341_v58 = vunpack.i.l.s16 %v195_v41 }
  0x1e   :  { %v169_v43 = vshll.u32 %v1330_v13, 16  ;;  %v898_v44 = vld [vmem:[#allocation5 + $0x30] sm:$0xf]  ;;  %v967_v45 = vor.u32 %v1092_v39, %v964_v40  ;;  %v1077_v47 = vld [vmem:[#allocation5 + $0x34] sm:$0xf0]  ;;  %v911_v51 = vor.u32 %v1078_v35, %v908_v38  ;;  %vm140_vm2 = vcmp.eq.s32.totalorder %v98_v33, 15 }
  0x1f   :  { %v938_v49 = vld [vmem:[#allocation5 + $0x80] sm:$0xf]  ;;  %v1090_v50 = vld [vmem:[#allocation5 + $0xa4] sm:$0xf]  ;;  %v1087_v52 = vld [vmem:[#allocation5 + $0x84] sm:$0xf0]  ;;  %v899_v63 = vor.u32 %v1077_v47, %v898_v44  ;;  %vm253_vm5 = vcmp.ne.s32.totalorder %v1341_v58, %v1344_v59 }
  0x20   :  { %430 = vmatpush.bf16.msra.mxu0 %v915_v29  ;;  %452 = vmatpush.bf16.msra.mxu1 %v955_v32  ;;  %v956_v53 = vld [vmem:[#allocation5 + $0xa8] sm:$0xf0]  ;;  %v217_v54 = vrot.slane %v162_v28, 1  ;;  %v1076_v55 = vld [vmem:[#allocation5 + $0x34] sm:$0xf]  ;;  %vm236_vm3 = vmpackc.low %vm140_vm2, %vm140_vm2  ;;  %v1350_v61 = vrot.slane %v169_v43, 1  ;;  %v939_v2 = vor.u32 %v1087_v52, %v938_v49 }
  0x21   :  { %468 = vmatpush.bf16.msra.mxu2 %v919_v34  ;;  %489 = vmatpush.bf16.msra.mxu3 %v967_v45  ;;  %v900_v56 = vld [vmem:[#allocation5 + $0x38] sm:$0xf0]  ;;  %v959_v57 = vor.u32 %v1090_v50, %v956_v53  ;;  %vm216_vm4 = vsmask.f32 7424  ;;  %v240_v62 = vsel %vm236_vm3, 65537, %v1278_v26  ;;  %vm269_vm7 = vcmask 523264  }
  0x22   :  { %v218_v60 = vor.u32 %v217_v54, %v159_v42  ;;  %v890_v0 = vld [vmem:[#allocation5 + $0x20] sm:$0xf]  ;;  %v244_v5 = vunpack.c.l.b16 %v240_v62  ;;  %v1088_v6 = vld [vmem:[#allocation5 + $0x94] sm:$0xf]  ;;  %v948_v7 = vld [vmem:[#allocation5 + $0x98] sm:$0xf0]  ;;  %v903_v8 = vor.u32 %v1076_v55, %v900_v56 }
  0x23   :  { %v1075_v9 = vld [vmem:[#allocation5 + $0x24] sm:$0xf0]  ;;  %v1074_v10 = vld [vmem:[#allocation5 + $0x24] sm:$0xf]  ;;  %v892_v11 = vld [vmem:[#allocation5 + $0x28] sm:$0xf0]  ;;  %v951_v12 = vor.u32 %v1088_v6, %v948_v7 }
  0x24   :  { %431 = vmatpush.bf16.msra.mxu0 %v907_v46  ;;  %453 = vmatpush.bf16.msra.mxu1 %v947_v48  ;;  %v869_v14 = vunpack.i.l.s16 %v244_v5  ;;  %v1086_v15 = vld [vmem:[#allocation5 + $0x84] sm:$0xf]  ;;  %v940_v16 = vld [vmem:[#allocation5 + $0x88] sm:$0xf0]  ;;  %v220_v17 = vsel %vm216_vm4, %v218_v60, %v1350_v61  ;;  %v891_v18 = vor.u32 %v1075_v9, %v890_v0  ;;  %v895_v19 = vor.u32 %v1074_v10, %v892_v11  ;;  %v882_v21 = vld [vmem:[#allocation5 + $0x10] sm:$0xf] }
  0x25   :  { %469 = vmatpush.bf16.msra.mxu2 %v911_v51  ;;  %490 = vmatpush.bf16.msra.mxu3 %v959_v57  ;;  %v1073_v22 = vld [vmem:[#allocation5 + $0x14] sm:$0xf0]  ;;  %v943_v23 = vor.u32 %v1086_v15, %v940_v16  ;;  %v1072_v25 = vld [vmem:[#allocation5 + $0x14] sm:$0xf]  ;;  %v884_v27 = vld [vmem:[#allocation5 + $0x18] sm:$0xf0] }
  0x26   :  { %vm254_vm6 = vcmp.ne.s32.totalorder %v869_v14, %v1354_v4  ;;  %v883_v29 = vor.u32 %v1073_v22, %v882_v21  ;;  %v887_v30 = vor.u32 %v1072_v25, %v884_v27  ;;  %v874_v31 = vld [vmem:[#allocation5] sm:$0xf]  ;;  %v1071_v32 = vld [vmem:[#allocation5 + $0x4] sm:$0xf0]  ;;  %v1070_v33 = vld [vmem:[#allocation5 + $0x4] sm:$0xf] }
  0x27   :  { %vm1364_vm8 = vmpackc.low %vm254_vm6, %vm253_vm5  ;;  %v876_v34 = vld [vmem:[#allocation5 + $0x8] sm:$0xf0]  ;;  %v875_v35 = vor.u32 %v1071_v32, %v874_v31  ;;  %v86_v37 = vadd.s32 24, %v1326_v3  ;;  %v166_v39 = vshrl.u32 %v1330_v13, 16  ;;  %vm224_vm11 = vcmask 1047552   ;;  %v1108_v6 = vld [vmem:[#allocation8 + $0x70] sm:$0xff] }
  0x28   :  { %432 = vmatpush.bf16.msra.mxu0 %v899_v63  ;;  %454 = vmatpush.bf16.msra.mxu1 %v939_v2  ;;  %v263_v24 = vsel %vm1364_vm8, 0, %v220_v17  ;;  %v879_v36 = vor.u32 %v1070_v33, %v876_v34  ;;  %v91_v41 = vand.u32 15, %v1326_v3  ;;  %vm1377_vm12 = vmand %vm224_vm11, %vm216_vm4  ;;  %v85_v52 = vadd.s32 16, %v1326_v3  ;;  %v1109_v63 = vld [vmem:[#allocation8 + $0x78] sm:$0xff]  ;;  %v1098_v14 = vld [vmem:[#allocation8 + $0x20] sm:$0xff]  ;;  %s1279_s2 = smov [#allocation10]  }
  0x29   :  { %470 = vmatpush.bf16.msra.mxu2 %v903_v8  ;;  %491 = vmatpush.bf16.msra.mxu3 %v951_v12  ;;  %v112_v38 = vand.u32 15, %v86_v37  ;;  %v221_v46 = vor.u32 %v1350_v61, %v166_v39  ;;  %v161_v55 = vrot.slane %v159_v42, 7  ;;  %vm157_vm1 = vsmask.f32 256  ;;  %v1101_v13 = vld [vmem:[#allocation8 + $0x38] sm:$0xff]  ;;  %v1106_v12 = vld [vmem:[#allocation8 + $0x60] sm:$0xff] }
  0x2a   :  { %vm135_vm13 = vcmp.eq.s32.totalorder %v91_v41, 0  ;;  %v105_v54 = vand.u32 15, %v85_v52  ;;  %vm175_vm2 = vcmask 1040384   ;;  %v168_v2 = vrot.slane %v166_v39, 7  ;;  %v1104_v15 = vld [vmem:[#allocation8 + $0x50] sm:$0xff]  ;;  %v1117_v16 = vld [vmem:[#allocation8 + $0xb8] sm:$0xff] }
  0x2b   :  { %968 = vmatmul.msk.bf16.vlgmr.msra.gmra.mxu1 %vm269_vm7, %v263_v24  ;;  %vm142_vm9 = vcmp.eq.s32.totalorder %v112_v38, 15  ;;  %v226_v48 = vsel %vm1377_vm12, %v221_v46, 0  ;;  %vm186_vm0 = vmpackc.low %vm135_vm13, %vm135_vm13  ;;  %v164_v57 = vor.u32 %v162_v28, %v161_v55  ;;  %v1097_v17 = vld [vmem:[#allocation8 + $0x18] sm:$0xff]  ;;  %v1096_v21 = vld [vmem:[#allocation8 + $0x10] sm:$0xff]  ;;  %s839_s3 = sshll.u32 %s1279_s2, 4  ;;  %s841_s13 = sshll.u32 %s1461_s4, 4  ;;  %s840_s3 = int_to_ptr.vmem [resolvable:$true] %s839_s3  ;;  %s842_s13 = int_to_ptr.hbm [resolvable:$true] %s841_s13 }
  0x2c   :  { %433 = vmatpush.bf16.msra.mxu0 %v891_v18  ;;  %vm238_vm10 = vmpackc.low %vm142_vm9, %vm142_vm9  ;;  %v190_v51 = vsel %vm186_vm0, 65537, %v1278_v26  ;;  %vm137_vm3 = vcmp.eq.s32.totalorder %v105_v54, 0  ;;  %vm205_vm9 = vcmp.ne.s32.totalorder %v1341_v58, %v1354_v4  ;;  %v171_v7 = vor.u32 %v169_v43, %v168_v2  ;;  %v1107_v43 = vld [vmem:[#allocation8 + $0x68] sm:$0xff]  ;;  %758 = vmatpush.bf16.msrb.mxu1 %v1101_v13  ;;  %v1102_v22 = vld [vmem:[#allocation8 + $0x40] sm:$0xff] }
  0x2d   :  { %471 = vmatpush.bf16.msra.mxu2 %v895_v19  ;;  %492 = vmatpush.bf16.msra.mxu3 %v943_v23  ;;  %v242_v40 = vsel %vm238_vm10, 65537, %v1278_v26  ;;  %v194_v53 = vunpack.c.l.b16 %v190_v51  ;;  %vm188_vm10 = vmpackc.low %vm137_vm3, %vm137_vm3  ;;  %v1099_v58 = vld [vmem:[#allocation8 + $0x28] sm:$0xff]  ;;  %v1116_v19 = vld [vmem:[#allocation8 + $0xb0] sm:$0xff] }
  0x2e   :  { %v246_v45 = vunpack.c.l.b16 %v242_v40  ;;  %v192_v28 = vsel %vm188_vm10, 65537, %v1278_v26  ;;  %v172_v26 = vsel %vm157_vm1, %v161_v55, %v171_v7  ;;  %v1103_v18 = vld [vmem:[#allocation8 + $0x48] sm:$0xff]  ;;  %v1114_v25 = vld [vmem:[#allocation8 + $0xa0] sm:$0xff]  ;;  %v1137_v31 = vld [vmem:[#allocation7] ss:$0 sm:$0xff] }
  0x2f   :  { %v864_v56 = vunpack.i.l.s16 %v194_v53  ;;  %v196_v61 = vunpack.c.l.b16 %v192_v28  ;;  %v1115_v23 = vld [vmem:[#allocation8 + $0xa8] sm:$0xff]  ;;  %v1112_v33 = vld [vmem:[#allocation8 + $0x90] sm:$0xff]  ;;  %v1138_v37 = vld [vmem:[#allocation7 + $0x1] ss:$0 sm:$0xff] }
  0x30   :  { %434 = vmatpush.bf16.msra.mxu0 %v883_v29  ;;  %970 = vmatmul.msk.bf16.vlgmr.msra.gmra.mxu3 %vm269_vm7, %v263_v24  ;;  %v871_v47 = vunpack.i.l.s16 %v246_v45  ;;  %v1095_v24 = vld [vmem:[#allocation8 + $0x8] sm:$0xff]  ;;  %v1094_v29 = vld [vmem:[#allocation8] sm:$0xff]  ;;  %v1140_v49 = vld [vmem:[#allocation7 + $0x3] ss:$0 sm:$0xff] }
  0x31   :  { %472 = vmatpush.bf16.msra.mxu2 %v887_v30  ;;  %vm204_vm6 = vcmp.ne.s32.totalorder %v864_v56, %v1344_v59  ;;  %v866_v5 = vunpack.i.l.s16 %v196_v61  ;;  %777 = vmatpush.bf16.msrb.mxu3 %v1109_v63  ;;  %v1113_v30 = vld [vmem:[#allocation8 + $0x98] sm:$0xff]  ;;  %v1110_v40 = vld [vmem:[#allocation8 + $0x80] sm:$0xff] }
  0x32   :  { %vm261_vm14 = vcmp.ne.s32.totalorder %v871_v47, %v1354_v4  ;;  %vm1415_vm11 = vmpackc.low %vm205_vm9, %vm204_vm6  ;;  %v1105_v4 = vld [vmem:[#allocation8 + $0x58] sm:$0xff] }
  0x33   :  { %vm1388_vm15 = vmpackc.low %vm261_vm14, %vm253_vm5  ;;  %vm211_vm13 = vcmp.ne.s32.totalorder %v866_v5, %v1344_v59  ;;  %v1100_v59 = vld [vmem:[#allocation8 + $0x30] sm:$0xff] }
  0x34   :  { %435 = vmatpush.bf16.msra.mxu0 %v875_v35  ;;  %v264_v50 = vsel %vm1388_vm15, 0, %v226_v48  ;;  %vm1403_vm5 = vmand %vm175_vm2, %vm157_vm1  ;;  %759 = vmatpush.bf16.msrb.mxu1 %v1100_v59  ;;  %v1111_v35 = vld [vmem:[#allocation8 + $0x88] sm:$0xff] }
  0x35   :  { %473 = vmatpush.bf16.msra.mxu2 %v879_v36  ;;  %v177_v3 = vsel %vm1403_vm5, 0, %v164_v57  ;;  %778 = vmatpush.bf16.msrb.mxu3 %v1108_v6  ;;  %vm1430_vm14 = vmpackc.low %vm205_vm9, %vm211_vm13 }
  0x36   :  { %v214_v42 = vsel %vm1415_vm11, 0, %v177_v3  ;;  %v215_v10 = vsel %vm1430_vm14, 0, %v172_v26 }
  0x38   :  { %760 = vmatpush.bf16.msrb.mxu1 %v1099_v58  ;;  %796 = vmatpush.bf16.msrb.mxu0 %v1117_v16 }
  0x39   :  { %779 = vmatpush.bf16.msrb.mxu3 %v1107_v43  ;;  %1118 = vmatpush.bf16.msrb.mxu2 %v1117_v16 }
  0x3b   :  { %969 = vmatmul.msk.bf16.gmra.mxu1 %vm269_vm7, %v264_v50 }
  0x3c   :  { %761 = vmatpush.bf16.msrb.mxu1 %v1098_v14  ;;  %797 = vmatpush.bf16.msrb.mxu0 %v1116_v19 }
  0x3d   :  { %780 = vmatpush.bf16.msrb.mxu3 %v1106_v12  ;;  %1119 = vmatpush.bf16.msrb.mxu2 %v1116_v19 }
  0x40   :  { %971 = vmatmul.msk.bf16.gmra.mxu3 %vm269_vm7, %v264_v50  ;;  %762 = vmatpush.bf16.msrb.mxu1 %v1097_v17 }
  0x41   :  { %781 = vmatpush.bf16.msrb.mxu3 %v1105_v4  ;;  %798 = vmatpush.bf16.msrb.mxu0 %v1115_v23 }
  0x42   :  { %1120 = vmatpush.bf16.msrb.mxu2 %v1115_v23 }
  0x44   :  { %763 = vmatpush.bf16.msrb.mxu1 %v1096_v21 }
  0x45   :  { %782 = vmatpush.bf16.msrb.mxu3 %v1104_v15  ;;  %799 = vmatpush.bf16.msrb.mxu0 %v1114_v25 }
  0x46   :  { %1121 = vmatpush.bf16.msrb.mxu2 %v1114_v25 }
  0x48   :  { %764 = vmatpush.bf16.msrb.mxu1 %v1095_v24 }
  0x49   :  { %783 = vmatpush.bf16.msrb.mxu3 %v1103_v18  ;;  %800 = vmatpush.bf16.msrb.mxu0 %v1113_v30 }
  0x4a   :  { %1122 = vmatpush.bf16.msrb.mxu2 %v1113_v30 }
  0x4c   :  { %765 = vmatpush.bf16.msrb.mxu1 %v1094_v29 }
  0x4d   :  { %784 = vmatpush.bf16.msrb.mxu3 %v1102_v22  ;;  %801 = vmatpush.bf16.msrb.mxu0 %v1112_v33 }
  0x4e   :  { %1123 = vmatpush.bf16.msrb.mxu2 %v1112_v33 }
  0x51   :  { %802 = vmatpush.bf16.msrb.mxu0 %v1111_v35 }
  0x52   :  { %1124 = vmatpush.bf16.msrb.mxu2 %v1111_v35 }
  0x55   :  { %803 = vmatpush.bf16.msrb.mxu0 %v1110_v40 }
  0x56   :  { %1125 = vmatpush.bf16.msrb.mxu2 %v1110_v40 }
  0x87   :  { %v266_v62 = vpop.permute.xlu0 %265 }
  0x88   :  { %v272_v0 = vsel %vm269_vm7, %v214_v42, %v266_v62 }
  0x89   :  { %436 = vmatmul.bf16.vlgmr.msra.gmra.mxu0 %v272_v0  ;;  %474 = vmatmul.bf16.vlgmr.msra.gmra.mxu2 %v272_v0 }
  0x8f   :  { %v268_v9 = vpop.permute.xlu0 %267 }
  0x90   :  { %v276_v11 = vsel %vm269_vm7, %v215_v10, %v268_v9 }
  0x99   :  { %441 = vmatmul.bf16.gmra.mxu0 %v276_v11  ;;  %479 = vmatmul.bf16.gmra.mxu2 %v276_v11 }
  0xa8   :  { %v456_v27 = vpop.f32.mrf.mxu1 }
  0xb0   :  { %v458_v38 = vpop.f32.mrf.mxu1 }
  0xb3   :  { %v494_v29 = vpop.f32.mrf.mxu3 }
  0xb8   :  { %v461_v50 = vpop.f32.mrf.mxu1 }
  0xbb   :  { %v496_v30 = vpop.f32.mrf.mxu3 }
  0xc0   :  { %v463_v62 = vpop.f32.mrf.mxu1 }
 0x106   :  { %v437_v32 = vpop.f32.mrf.mxu0 }
 0x107   :  { %v457_v34 = vadd.f32 %v456_v27, %v437_v32 }
 0x109   :  { %v507_v36 = vmul.f32 %v1137_v31, %v457_v34 }
 0x10b   :  { %v512_v39 = vadd.f32 %v1138_v37, %v507_v36 }
 0x10c   :  { %v475_v32 = vpop.f32.mrf.mxu2 }
 0x10d   :  { %v516_v46 = vmax.f32 %v512_v39, 0.0  ;;  %v1139_v39 = vld [vmem:[#allocation7 + $0x2] ss:$0 sm:$0xff] }
 0x10e   :  { %v439_v41 = vpop.f32.mrf.mxu0 }
 0x10f   :  { %v459_v45 = vadd.f32 %v458_v38, %v439_v41  ;;  %v520_v51 = vpack.c.bf16 %v516_v46, %v516_v46 }
 0x111   :  { %v508_v47 = vmul.f32 %v1137_v31, %v459_v45  ;;  %v528_v57 = vunpack.c.l.b16 %v520_v51 }
 0x113   :  { %v513_v48 = vadd.f32 %v1138_v37, %v508_v47  ;;  %v495_v47 = vadd.f32 %v494_v29, %v475_v32 }
 0x114   :  { %v477_v33 = vpop.f32.mrf.mxu2 }
 0x115   :  { %v517_v52 = vmax.f32 %v513_v48, 0.0 }
 0x116   :  { %v442_v53 = vpop.f32.mrf.mxu0 }
 0x117   :  { %v521_v54 = vpack.c.bf16 %v517_v52, %v517_v52  ;;  %v462_v55 = vadd.f32 %v461_v50, %v442_v53 }
 0x119   :  { %v509_v56 = vmul.f32 %v1137_v31, %v462_v55  ;;  %v529_v3 = vunpack.c.l.b16 %v521_v54 }
 0x11b   :  { %v532_v28 = vpack.c.b16 %v529_v3, %v528_v57  ;;  %v514_v42 = vadd.f32 %v1138_v37, %v509_v56 }
 0x11c   :  { %v480_v36 = vpop.f32.mrf.mxu2 }
 0x11d   :  { %v535_v61 = vshrl.u32 %v532_v28, 16  ;;  %785 = vmatmul.bf16.vlgmr.msrb.gmra.mxu3 %v532_v28  ;;  %v538_v5 = vshll.u32 %v532_v28, 16  ;;  %v518_v6 = vmax.f32 %v514_v42, 0.0  ;;  %v497_v42 = vadd.f32 %v496_v30, %v477_v33 }
 0x11e   :  { %v444_v63 = vpop.f32.mrf.mxu0 }
 0x11f   :  { %v464_v0 = vadd.f32 %v463_v62, %v444_v63  ;;  %v537_v2 = vrot.slane %v535_v61, 7  ;;  %v522_v13 = vpack.c.bf16 %v518_v6, %v518_v6  ;;  %v554_v4 = vrot.slane %v538_v5, 1 }
 0x121   :  { %v510_v7 = vmul.f32 %v1137_v31, %v464_v0  ;;  %v540_v26 = vor.u32 %v538_v5, %v537_v2  ;;  %v530_v12 = vunpack.c.l.b16 %v522_v13  ;;  %v555_v17 = vor.u32 %v554_v4, %v535_v61  ;;  %v499_v31 = vpop.f32.mrf.mxu3 }
 0x122   :  { %v500_v63 = vadd.f32 %v499_v31, %v480_v36 }
 0x123   :  { %v515_v9 = vadd.f32 %v1138_v37, %v510_v7  ;;  %v551_v10 = vsel %vm1403_vm5, 0, %v540_v26 }
 0x124   :  { %v552_v11 = vsel %vm1415_vm11, 0, %v551_v10  ;;  %v482_v40 = vpop.f32.mrf.mxu2 }
 0x125   :  { %v519_v43 = vmax.f32 %v515_v9, 0.0  ;;  %766 = vmatmul.bf16.vlgmr.msrb.gmra.mxu1 %v552_v11 }
 0x127   :  { %v523_v59 = vpack.c.bf16 %v519_v43, %v519_v43 }
 0x129   :  { %v531_v58 = vunpack.c.l.b16 %v523_v59  ;;  %v501_v20 = vpop.f32.mrf.mxu3 }
 0x12a   :  { %v502_v11 = vadd.f32 %v501_v20, %v482_v40 }
 0x12b   :  { %v533_v14 = vpack.c.b16 %v531_v58, %v530_v12 }
 0x12d   :  { %v542_v15 = vshrl.u32 %v533_v14, 16  ;;  %v545_v16 = vshll.u32 %v533_v14, 16  ;;  %790 = vmatmul.bf16.gmra.mxu3 %v533_v14 }
 0x12f   :  { %v556_v18 = vrot.slane %v545_v16, 1  ;;  %v544_v19 = vrot.slane %v542_v15, 7 }
 0x131   :  { %v557_v60 = vsel %vm216_vm4, %v555_v17, %v556_v18  ;;  %v547_v21 = vor.u32 %v545_v16, %v544_v19  ;;  %v558_v22 = vor.u32 %v556_v18, %v542_v15 }
 0x132   :  { %v562_v1 = vsel %vm1364_vm8, 0, %v557_v60 }
 0x133   :  { %804 = vmatmul.bf16.vlgmr.msrb.gmra.mxu0 %v562_v1  ;;  %v548_v23 = vsel %vm157_vm1, %v537_v2, %v547_v21  ;;  %v561_v24 = vsel %vm1377_vm12, %v558_v22, 0 }
 0x134   :  { %v553_v25 = vsel %vm1430_vm14, 0, %v548_v23  ;;  %v563_v27 = vsel %vm1388_vm15, 0, %v561_v24 }
 0x135   :  { %771 = vmatmul.bf16.gmra.mxu1 %v553_v25  ;;  %809 = vmatmul.bf16.vlgmr.msrb.gmra.mxu2 %v563_v27 }
 0x1a0   :  { %v786_v34 = vpop.f32.mrf.mxu3 }
 0x1a2   :  { %v767_v35 = vpop.f32.mrf.mxu1 }
 0x1a3   :  { %v787_v38 = vadd.f32 %v786_v34, %v767_v35 }
 0x1a8   :  { %v788_v44 = vpop.f32.mrf.mxu3 }
 0x1aa   :  { %v769_v37 = vpop.f32.mrf.mxu1 }
 0x1ab   :  { %v789_v51 = vadd.f32 %v788_v44, %v769_v37 }
 0x1b0   :  { %v805_v8 = vpop.f32.mrf.mxu0  ;;  %v791_v48 = vpop.f32.mrf.mxu3 }
 0x1b1   :  { %v806_v41 = vadd.f32 %v805_v8, %v787_v38 }
 0x1b2   :  { %v772_v46 = vpop.f32.mrf.mxu1 }
 0x1b3   :  { %v818_v45 = vmul.f32 %v1139_v39, %v806_v41  ;;  %v792_v53 = vadd.f32 %v791_v48, %v772_v46 }
 0x1b5   :  { %v823_v50 = vadd.f32 %v1140_v49, %v818_v45 }
 0x1b7   :  { %v827_v52 = vadd.f32 %v823_v50, %v495_v47 }
 0x1b8   :  { %v807_v54 = vpop.f32.mrf.mxu0  ;;  %v810_v56 = vpop.f32.mrf.mxu2 }
 0x1b9   :  { %831 = vst [vmem:[#allocation10] sm:$0xff] %v827_v52  ;;  %v808_v55 = vadd.f32 %v807_v54, %v789_v51  ;;  %v811_v57 = vadd.f32 %v810_v56, %v792_v53  ;;  %v793_v2 = vpop.f32.mrf.mxu3 }
 0x1ba   :  { %v774_v62 = vpop.f32.mrf.mxu1 }
 0x1bb   :  { %v819_v3 = vmul.f32 %v1139_v39, %v808_v55  ;;  %v820_v28 = vmul.f32 %v1139_v39, %v811_v57  ;;  %v794_v7 = vadd.f32 %v793_v2, %v774_v62 }
 0x1bd   :  { %v824_v61 = vadd.f32 %v1140_v49, %v819_v3  ;;  %v825_v0 = vadd.f32 %v1140_v49, %v820_v28 }
 0x1bf   :  { %v828_v5 = vadd.f32 %v824_v61, %v497_v42  ;;  %v829_v6 = vadd.f32 %v825_v0, %v500_v63 }
 0x1c0   :  { %v812_v26 = vpop.f32.mrf.mxu2 }
 0x1c1   :  { %832 = vst [vmem:[#allocation10 + $0x8] sm:$0xff] %v828_v5  ;;  %v813_v9 = vadd.f32 %v812_v26, %v794_v7 }
 0x1c2   :  { %833 = vst [vmem:[#allocation10 + $0x10] sm:$0xff] %v829_v6 }
 0x1c3   :  { %v821_v10 = vmul.f32 %v1139_v39, %v813_v9 }
 0x1c5   :  { %v826_v13 = vadd.f32 %v1140_v49, %v821_v10 }
 0x1c7   :  { %v830_v43 = vadd.f32 %v826_v13, %v502_v11 }
 0x1c9   :  { %834 = vst [vmem:[#allocation10 + $0x18] sm:$0xff] %v830_v43 }
 0x1ca   :  { %847 = dma.vmem_to_hbm [thread:$0]  %s840_s3, 512, %s842_s13, [#allocation4], %s1270_s23, %s1270_s23, %s1271_s24  }
 0x1cb   :  { %1267 = dma.done.wait [#allocation4], 512  }
 0x1cc   :  { %1268 = vsyncadd [#allocation4], 4294966784 }
 0x1cd   :  { %852 = vsyncpa [#allocation3], 1 }
 0x1ce   :  { %853 = vsyncpa [#allocation6], 1 }
 0x1cf   :  { %854 = vsyncpa [#allocation9], 1 }
 0x1d0   :  { %855 = vsyncpa [#allocation4], 1 }

</bundles_post_ra>
